<compile_context>
chip_gen: v7x
topology: tpu7x:2x2x1
jax: 0.10.0
libtpu: 0.0.40
codegen_flags: <defaults>
</compile_context>

<pallas_src>
import math

import jax
import jax.numpy as jnp
from jax import lax
from jax.experimental import pallas as pl
from jax.experimental.pallas import tpu as pltpu


def _vmem_limit_bytes(nbytes):
    """Shape-derived VMEM cap with headroom, clamped to [32 MiB, 96 MiB]."""
    need = int(nbytes * 2) + (4 << 20)
    return int(max(32 << 20, min(96 << 20, need)))


# ---------------------------------------------------------------------------
# Single-step kernel: exactly the PyTorch module's forward().
# ---------------------------------------------------------------------------
def _lstm_cell_kernel(xh_ref, wf_ref, b_ref, c_ref, h_out_ref, c_out_ref):
    m = c_ref.shape[-1]

    # One fused MXU matmul (K padded to a multiple of 128), f32 accumulation,
    # f32 bias add on the accumulator.
    a = (jnp.dot(xh_ref[...], wf_ref[...], preferred_element_type=jnp.float32)
         + b_ref[...])

    # i, f, o are adjacent -> one sigmoid over the contiguous 3m slab.
    ifo = jax.nn.sigmoid(a[:, :3 * m])
    g = jnp.tanh(a[:, 3 * m:])
    i = ifo[:, 0 * m:1 * m]
    f = ifo[:, 1 * m:2 * m]
    o = ifo[:, 2 * m:3 * m]

    c_out = i * g + f * c_ref[...].astype(jnp.float32)
    h_out = o * jnp.tanh(c_out)

    h_out_ref[...] = h_out.astype(h_out_ref.dtype)
    c_out_ref[...] = c_out.astype(c_out_ref.dtype)


def pack_step_weights(W, V, b, mxu_dtype=jnp.bfloat16):
    """Fuse [W; V] into one K-padded bf16 matrix; bias stays f32.

    Hoist this out of any per-step call path (it is HBM weight traffic)."""
    n, p = W.shape
    m = V.shape[0]
    K = n + m
    Kp = ((K + 127) // 128) * 128          # clean MXU / (8,128) tiling
    wf = jnp.concatenate([W, V], axis=0).astype(mxu_dtype)      # (n+m, 4m)
    wf = jnp.pad(wf, ((0, Kp - K), (0, 0)))                     # (Kp, 4m)
    bias = b.astype(jnp.float32)[None, :]                       # (1, 4m) f32
    return wf, bias


def lstm_cell(x, h, c, W, V, b, *, packed=None, mxu_dtype=jnp.bfloat16):
    """One LSTMCell step. x:(B,n) h:(B,m) c:(B,m) W:(n,4m) V:(m,4m) b:(4m,)."""
    B, n = x.shape
    _, m = h.shape
    p = 4 * m
    assert W.shape == (n, p) and V.shape == (m, p) and b.shape == (p,)

    if packed is None:
        packed = pack_step_weights(W, V, b, mxu_dtype)
    wf, bias = packed
    Kp = wf.shape[0]

    xh = jnp.concatenate([x, h], axis=-1).astype(mxu_dtype)     # (B, n+m)
    xh = jnp.pad(xh, ((0, 0), (0, Kp - (n + m))))               # (B, Kp)

    full = lambda shape: pl.BlockSpec(shape, lambda: (0,) * len(shape))

    vmem_bytes = (2 * (B * Kp * 2) + 2 * (Kp * p * 2) + 2 * (1 * p * 4)
                  + 2 * (B * m * 4) + 2 * 2 * (B * m * 4))

    h_out, c_out = pl.pallas_call(
        _lstm_cell_kernel,
        out_shape=(
            jax.ShapeDtypeStruct((B, m), x.dtype),
            jax.ShapeDtypeStruct((B, m), x.dtype),
        ),
        grid=(),
        in_specs=[
            full(xh.shape),      # [x, h] padded  (bf16)
            full(wf.shape),      # [W; V] padded  (bf16)
            full(bias.shape),    # bias           (f32)
            full((B, m)),        # c              (f32)
        ],
        out_specs=(full((B, m)), full((B, m))),
        compiler_params=pltpu.CompilerParams(
            vmem_limit_bytes=_vmem_limit_bytes(vmem_bytes)),
    )(xh, wf, bias, c)
    return h_out, c_out


# ---------------------------------------------------------------------------
# Fused recurrence kernel: time chunked per grid step, weights VMEM-resident,
# h/c carried in f32 VMEM scratch, input projection hoisted to one big GEMM.
# ---------------------------------------------------------------------------
def _lstm_seq_kernel(a_ref, v_ref, h0_ref, c0_ref,
                     h_seq_ref, c_out_ref, h_scr, c_scr):
    # grid = (batch_blocks "parallel", time_chunks "arbitrary")
    ti = pl.program_id(1)
    m = h_scr.shape[-1]
    TT = a_ref.shape[0]

    @pl.when(ti == 0)
    def _():
        h_scr[...] = h0_ref[...].astype(jnp.float32)
        c_scr[...] = c0_ref[...].astype(jnp.float32)

    def step(t, carry):
        # a_t = (x_t @ W + b)  [precomputed, f32]  +  h_{t-1} @ V  [bf16 MXU]
        a = a_ref[t] + jnp.dot(h_scr[...].astype(v_ref.dtype), v_ref[...],
                               preferred_element_type=jnp.float32)
        ifo = jax.nn.sigmoid(a[:, :3 * m])     # i, f, o in one EUP slab
        g = jnp.tanh(a[:, 3 * m:])
        i = ifo[:, 0 * m:1 * m]
        f = ifo[:, 1 * m:2 * m]
        o = ifo[:, 2 * m:3 * m]

        c_new = i * g + f * c_scr[...]
        h_new = o * jnp.tanh(c_new)
        c_scr[...] = c_new
        h_scr[...] = h_new
        h_seq_ref[t] = h_new.astype(h_seq_ref.dtype)
        return carry

    lax.fori_loop(0, TT, step, 0, unroll=min(TT, 8))

    @pl.when(ti == pl.num_programs(1) - 1)
    def _():
        c_out_ref[...] = c_scr[...].astype(c_out_ref.dtype)


def _pick_time_chunk(T, B, p, m, budget_bytes=16 << 20):
    """Largest divisor of T whose double-buffered A + h_seq chunks fit."""
    for tt in range(T, 0, -1):
        if T % tt:
            continue
        per = 2 * tt * B * p * 4 + 2 * tt * B * m * 4
        if per <= budget_bytes:
            return tt
    return 1


def lstm_sequence(x_seq, h0, c0, W, V, b, *, mxu_dtype=jnp.bfloat16,
                  time_chunk=None, batch_block=None):
    """Run the LSTMCell over a sequence. x_seq:(T,B,n) -> (h_seq:(T,B,m), c_T:(B,m))."""
    T, B, n = x_seq.shape
    _, m = h0.shape
    p = 4 * m
    assert W.shape == (n, p) and V.shape == (m, p) and b.shape == (p,)

    # Hoisted input projection: one big GEMM with M = T*B (parallel, handled by
    # XLA / MXU-friendly), bias folded in at f32. Only h @ V stays serial.
    a_all = (jnp.reshape(x_seq, (T * B, n)) @ W + b).astype(jnp.float32)
    a_all = jnp.reshape(a_all, (T, B, p))                       # (T, B, 4m) f32

    v = V.astype(mxu_dtype)                                     # resident bf16

    TT = time_chunk if time_chunk is not None else _pick_time_chunk(T, B, p, m)
    assert T % TT == 0
    bb = batch_block if batch_block is not None else B
    assert B % bb == 0 and (bb == B or bb % 8 == 0)
    nb, nt = B // bb, T // TT

    vmem_bytes = (2 * (m * p * 2)                # V (double-buffered resident)
                  + 2 * (TT * bb * p * 4)        # A chunk
                  + 2 * (TT * bb * m * 4)        # h_seq chunk
                  + 4 * (bb * m * 4)             # h0, c0
                  + 2 * (bb * m * 4)             # c_T
                  + 2 * (bb * m * 4))            # scratch carries

    h_seq, c_out = pl.pallas_call(
        _lstm_seq_kernel,
        out_shape=(
            jax.ShapeDtypeStruct((T, B, m), x_seq.dtype),
            jax.ShapeDtypeStruct((B, m), x_seq.dtype),
        ),
        grid_spec=pltpu.PrefetchScalarGridSpec(
            num_scalar_prefetch=0,
            grid=(nb, nt),
            in_specs=[
                pl.BlockSpec((TT, bb, p), lambda bi, ti: (ti, bi, 0)),  # A chunk
                pl.BlockSpec((m, p), lambda bi, ti: (0, 0)),            # V resident
                pl.BlockSpec((bb, m), lambda bi, ti: (bi, 0)),          # h0
                pl.BlockSpec((bb, m), lambda bi, ti: (bi, 0)),          # c0
            ],
            out_specs=(
                pl.BlockSpec((TT, bb, m), lambda bi, ti: (ti, bi, 0)),  # h_seq chunk
                pl.BlockSpec((bb, m), lambda bi, ti: (bi, 0)),          # final c
            ),
            scratch_shapes=[
                pltpu.VMEM((bb, m), jnp.float32),   # h carry
                pltpu.VMEM((bb, m), jnp.float32),   # c carry
            ],
        ),
        compiler_params=pltpu.CompilerParams(
            dimension_semantics=("parallel", "arbitrary"),
            vmem_limit_bytes=_vmem_limit_bytes(vmem_bytes)),
    )(a_all, v, h0, c0)
    return h_seq, c_out


# ---------------------------------------------------------------------------
# Pure-JAX references (f32, matching the PyTorch module exactly).
# ---------------------------------------------------------------------------
def lstm_cell_ref(x, h, c, W, V, b):
    a = b[None, :] + x @ W + h @ V
    m = h.shape[-1]
    i = jax.nn.sigmoid(a[:, 0 * m:1 * m])
    f = jax.nn.sigmoid(a[:, 1 * m:2 * m])
    o = jax.nn.sigmoid(a[:, 2 * m:3 * m])
    g = jnp.tanh(a[:, 3 * m:4 * m])
    c_out = i * g + f * c
    h_out = o * jnp.tanh(c_out)
    return h_out, c_out


def lstm_sequence_ref(x_seq, h0, c0, W, V, b):
    def step(carry, x_t):
        h, c = lstm_cell_ref(x_t, carry[0], carry[1], W, V, b)
        return (h, c), h
    (_, c_T), h_seq = jax.lax.scan(step, (h0, c0), x_seq)
    return h_seq, c_T


if __name__ == "__main__":
    vocab_size = 32     # n  (input features)
    hidden_size = 128   # m  (hidden units) — multiple of 128 => lane-aligned gates
    batch = 8           # B
    seq_len = 8         # T (for the fused-recurrence variant)

    n, m = vocab_size, hidden_size
    p = 4 * m
    k = math.sqrt(1.0 / m)

    key = jax.random.PRNGKey(0)
    kW, kV, kb, kx, kh, kc, kseq = jax.random.split(key, 7)

    # Deterministic parameter init matching torch's uniform_(-k, k) shapes.
    W = jax.random.uniform(kW, (n, p), jnp.float32, minval=-k, maxval=k)
    V = jax.random.uniform(kV, (m, p), jnp.float32, minval=-k, maxval=k)
    b = jax.random.uniform(kb, (p,), jnp.float32, minval=-k, maxval=k)

    x = jax.random.normal(kx, (batch, n), jnp.float32)
    h = jax.random.normal(kh, (batch, m), jnp.float32)
    c = jax.random.normal(kc, (batch, m), jnp.float32)
    x_seq = jax.random.normal(kseq, (seq_len, batch, n), jnp.float32)

    # --- single-step kernel (the module's forward) -------------------------
    h_out, c_out = jax.jit(lstm_cell)(x, h, c, W, V, b)
    jax.block_until_ready((h_out, c_out))
    h_r, c_r = lstm_cell_ref(x, h, c, W, V, b)
    assert h_out.shape == (batch, m) and c_out.shape == (batch, m)
    # bf16 MXU operands (x, h, W, V) vs f32 reference; bias added in f32.
    assert jnp.allclose(h_out, h_r, atol=2e-2, rtol=2e-2)
    assert jnp.allclose(c_out, c_r, atol=2e-2, rtol=2e-2)

    # --- fused-recurrence kernel (weights resident, T=8 in one grid step) --
    h_seq, c_T = jax.jit(lstm_sequence)(x_seq, h, c, W, V, b)
    jax.block_until_ready((h_seq, c_T))
    h_seq_r, c_T_r = lstm_sequence_ref(x_seq, h, c, W, V, b)
    assert h_seq.shape == (seq_len, batch, m) and c_T.shape == (batch, m)
    assert jnp.allclose(h_seq, h_seq_r, atol=3e-2, rtol=3e-2)
    assert jnp.allclose(c_T, c_T_r, atol=3e-2, rtol=3e-2)

    print("KERNEL_OK")
</pallas_src>

<mosaic_0001>
module attributes {stable_mosaic.version = 11 : i64} {
  func.func @_lstm_cell_kernel(%arg0: memref<8x256xbf16, #tpu.memory_space<vmem>>, %arg1: memref<256x512xbf16, #tpu.memory_space<vmem>>, %arg2: memref<1x512xf32, #tpu.memory_space<vmem>>, %arg3: memref<8x128xf32, #tpu.memory_space<vmem>>, %arg4: memref<8x128xf32, #tpu.memory_space<vmem>>, %arg5: memref<8x128xf32, #tpu.memory_space<vmem>>) attributes {dimension_semantics = [], scalar_prefetch = 0 : i64, scratch_operands = 0 : i64, tpu.core_type = #tpu.core_type<tc>} {
    %c0 = arith.constant 0 : index
    %c0_0 = arith.constant 0 : index
    %0 = vector.load %arg0[%c0, %c0_0] : memref<8x256xbf16, #tpu.memory_space<vmem>>, vector<8x256xbf16>
    %c0_1 = arith.constant 0 : index
    %c0_2 = arith.constant 0 : index
    %1 = vector.load %arg1[%c0_1, %c0_2] : memref<256x512xbf16, #tpu.memory_space<vmem>>, vector<256x512xbf16>
    %cst = arith.constant dense<0.000000e+00> : vector<8x512xf32>
    %2 = tpu.matmul %0, %1, %cst {dimension_numbers = #tpu.dot_dimension_numbers<[1], [0], [0], [1], [0, 0, 1, 1], [], []>} : vector<8x256xbf16>, vector<256x512xbf16>, vector<8x512xf32> -> vector<8x512xf32>
    %c0_3 = arith.constant 0 : index
    %c0_4 = arith.constant 0 : index
    %3 = vector.load %arg2[%c0_3, %c0_4] : memref<1x512xf32, #tpu.memory_space<vmem>>, vector<1x512xf32>
    %4 = vector.broadcast %3 : vector<1x512xf32> to vector<8x512xf32>
    %5 = arith.addf %2, %4 : vector<8x512xf32>
    %6 = vector.extract_strided_slice %5 {offsets = [0, 0], sizes = [8, 384], strides = [1, 1]} : vector<8x512xf32> to vector<8x384xf32>
    %7 = arith.negf %6 : vector<8x384xf32>
    %8 = math.exp %7 : vector<8x384xf32>
    %cst_5 = arith.constant 1.000000e+00 : f32
    %9 = vector.broadcast %cst_5 : f32 to vector<8x384xf32>
    %10 = arith.addf %9, %8 : vector<8x384xf32>
    %11 = arith.divf %9, %10 : vector<8x384xf32>
    %12 = vector.extract_strided_slice %5 {offsets = [0, 384], sizes = [8, 128], strides = [1, 1]} : vector<8x512xf32> to vector<8x128xf32>
    %13 = math.tanh %12 : vector<8x128xf32>
    %14 = vector.extract_strided_slice %11 {offsets = [0, 0], sizes = [8, 128], strides = [1, 1]} : vector<8x384xf32> to vector<8x128xf32>
    %15 = vector.extract_strided_slice %11 {offsets = [0, 128], sizes = [8, 128], strides = [1, 1]} : vector<8x384xf32> to vector<8x128xf32>
    %16 = vector.extract_strided_slice %11 {offsets = [0, 256], sizes = [8, 128], strides = [1, 1]} : vector<8x384xf32> to vector<8x128xf32>
    %17 = arith.mulf %14, %13 : vector<8x128xf32>
    %c0_6 = arith.constant 0 : index
    %c0_7 = arith.constant 0 : index
    %18 = vector.load %arg3[%c0_6, %c0_7] : memref<8x128xf32, #tpu.memory_space<vmem>>, vector<8x128xf32>
    %19 = arith.mulf %15, %18 : vector<8x128xf32>
    %20 = arith.addf %17, %19 : vector<8x128xf32>
    %21 = math.tanh %20 : vector<8x128xf32>
    %22 = arith.mulf %16, %21 : vector<8x128xf32>
    %c0_8 = arith.constant 0 : index
    %c0_9 = arith.constant 0 : index
    %23 = vector.load %arg4[%c0_8, %c0_9] : memref<8x128xf32, #tpu.memory_space<vmem>>, vector<8x128xf32>
    tpu.vector_store %arg4[%c0_8, %c0_9], %22 {strides = array<i32>} : memref<8x128xf32, #tpu.memory_space<vmem>>, vector<8x128xf32>,
    %c0_10 = arith.constant 0 : index
    %c0_11 = arith.constant 0 : index
    %24 = vector.load %arg5[%c0_10, %c0_11] : memref<8x128xf32, #tpu.memory_space<vmem>>, vector<8x128xf32>
    tpu.vector_store %arg5[%c0_10, %c0_11], %20 {strides = array<i32>} : memref<8x128xf32, #tpu.memory_space<vmem>>, vector<8x128xf32>,
    return
  }
}

</mosaic_0001>

<bundles_post_ra>
// kernel: lstm_cell.1
= control target key start
LH: loop header
LB: loop body
LE: loop exit
PB: predicated region body
PF: predicated region fallthrough
CT: control target
= control target key end

     0   :  { %11 = vsyncpa [#allocation3], 0  ;;  %s1062_s0 = inlined_call_operand.vmem [shape: bf16[8,256], index: 0, kind: input, shape index: {}]   ;;  %s1063_s1 = inlined_call_operand.vmem [shape: bf16[256,512], index: 1, kind: input, shape index: {}]   ;;  %s1064_s2 = inlined_call_operand.vmem [shape: f32[1,512], index: 2, kind: input, shape index: {}]   ;;  %s1065_s3 = inlined_call_operand.vmem [shape: f32[8,128], index: 3, kind: input, shape index: {}]   ;;  %s1066_s4 = inlined_call_operand.hbm [shape: f32[8,128], index: 4, kind: output, shape index: {0}]   ;;  %s1067_s5 = inlined_call_operand.hbm [shape: f32[8,128], index: 5, kind: output, shape index: {1}]  }
   0x1   :  { %v643_v0 = vld [vmem:[%s1063_s1 + $0x4] ss:$16 sps:$4 sm:$0xff]   ;;  %v645_v1 = vld [vmem:[%s1063_s1] ss:$16 sps:$4 sm:$0xff]   ;;  %v654_v5 = vld [vmem:[%s1063_s1 + $0xc] ss:$16 sps:$4 sm:$0xff]  }
   0x2   :  { %435 = vmatprep.subr.bf16.mxu0 %v643_v0  ;;  %v646_v2 = vld [vmem:[%s1063_s1 + $0x24] ss:$16 sps:$4 sm:$0xff]   ;;  %v648_v3 = vld [vmem:[%s1063_s1 + $0x20] ss:$16 sps:$4 sm:$0xff]   ;;  %v657_v6 = vld [vmem:[%s1063_s1 + $0x8] ss:$16 sps:$4 sm:$0xff]   ;;  %476 = vmatprep.subr.bf16.mxu1 %v654_v5 }
   0x3   :  { %436 = vmatpush1.bf16.msra.mxu0 %v645_v1  ;;  %v649_v4 = vld [vmem:[%s1063_s1 + $0x44] ss:$16 sps:$4 sm:$0xff]   ;;  %v651_v7 = vld [vmem:[%s1063_s1 + $0x40] ss:$16 sps:$4 sm:$0xff]   ;;  %477 = vmatpush1.bf16.msra.mxu1 %v657_v6  ;;  %v660_v9 = vld [vmem:[%s1063_s1 + $0x2c] ss:$16 sps:$4 sm:$0xff]  }
   0x4   :  { %437 = vmatprep.subr.bf16.mxu0 %v646_v2  ;;  %v652_v8 = vld [vmem:[%s1063_s1 + $0x64] ss:$16 sps:$4 sm:$0xff]   ;;  %v663_v10 = vld [vmem:[%s1063_s1 + $0x28] ss:$16 sps:$4 sm:$0xff]   ;;  %478 = vmatprep.subr.bf16.mxu1 %v660_v9  ;;  %v656_v11 = vld [vmem:[%s1063_s1 + $0x60] ss:$16 sps:$4 sm:$0xff]  }
   0x5   :  { %v658_v12 = vld [vmem:[%s1063_s1 + $0x84] ss:$16 sps:$4 sm:$0xff]   ;;  %v666_v13 = vld [vmem:[%s1063_s1 + $0x4c] ss:$16 sps:$4 sm:$0xff]   ;;  %v669_v14 = vld [vmem:[%s1063_s1 + $0x48] ss:$16 sps:$4 sm:$0xff]  }
   0x6   :  { %v672_v15 = vld [vmem:[%s1063_s1 + $0x6c] ss:$16 sps:$4 sm:$0xff]   ;;  %v662_v16 = vld [vmem:[%s1063_s1 + $0x80] ss:$16 sps:$4 sm:$0xff]   ;;  %v664_v17 = vld [vmem:[%s1063_s1 + $0xa4] ss:$16 sps:$4 sm:$0xff]  }
   0x7   :  { %438 = vmatpush1.bf16.msra.mxu0 %v648_v3  ;;  %479 = vmatpush1.bf16.msra.mxu1 %v663_v10  ;;  %v675_v18 = vld [vmem:[%s1063_s1 + $0x68] ss:$16 sps:$4 sm:$0xff]   ;;  %v678_v19 = vld [vmem:[%s1063_s1 + $0x8c] ss:$16 sps:$4 sm:$0xff]   ;;  %v668_v20 = vld [vmem:[%s1063_s1 + $0xa0] ss:$16 sps:$4 sm:$0xff]  }
   0x8   :  { %439 = vmatprep.subr.bf16.mxu0 %v649_v4  ;;  %480 = vmatprep.subr.bf16.mxu1 %v666_v13  ;;  %v670_v21 = vld [vmem:[%s1063_s1 + $0xc4] ss:$16 sps:$4 sm:$0xff]   ;;  %v681_v22 = vld [vmem:[%s1063_s1 + $0x88] ss:$16 sps:$4 sm:$0xff]   ;;  %v684_v23 = vld [vmem:[%s1063_s1 + $0xac] ss:$16 sps:$4 sm:$0xff]  }
   0x9   :  { %v674_v24 = vld [vmem:[%s1063_s1 + $0xc0] ss:$16 sps:$4 sm:$0xff]   ;;  %v676_v25 = vld [vmem:[%s1063_s1 + $0xe4] ss:$16 sps:$4 sm:$0xff]   ;;  %v687_v26 = vld [vmem:[%s1063_s1 + $0xa8] ss:$16 sps:$4 sm:$0xff]  }
   0xa   :  { %v690_v27 = vld [vmem:[%s1063_s1 + $0xcc] ss:$16 sps:$4 sm:$0xff]   ;;  %v680_v28 = vld [vmem:[%s1063_s1 + $0xe0] ss:$16 sps:$4 sm:$0xff]   ;;  %v682_v29 = vld [vmem:[%s1063_s1 + $0x104] ss:$16 sps:$4 sm:$0xff]  }
   0xb   :  { %440 = vmatpush1.bf16.msra.mxu0 %v651_v7  ;;  %481 = vmatpush1.bf16.msra.mxu1 %v669_v14  ;;  %v693_v30 = vld [vmem:[%s1063_s1 + $0xc8] ss:$16 sps:$4 sm:$0xff]   ;;  %v696_v31 = vld [vmem:[%s1063_s1 + $0xec] ss:$16 sps:$4 sm:$0xff]   ;;  %v686_v32 = vld [vmem:[%s1063_s1 + $0x100] ss:$16 sps:$4 sm:$0xff]  }
   0xc   :  { %441 = vmatprep.subr.bf16.mxu0 %v652_v8  ;;  %482 = vmatprep.subr.bf16.mxu1 %v672_v15  ;;  %v688_v33 = vld [vmem:[%s1063_s1 + $0x124] ss:$16 sps:$4 sm:$0xff]   ;;  %v699_v34 = vld [vmem:[%s1063_s1 + $0xe8] ss:$16 sps:$4 sm:$0xff]   ;;  %v702_v35 = vld [vmem:[%s1063_s1 + $0x10c] ss:$16 sps:$4 sm:$0xff]  }
   0xd   :  { %v692_v36 = vld [vmem:[%s1063_s1 + $0x120] ss:$16 sps:$4 sm:$0xff]   ;;  %v694_v37 = vld [vmem:[%s1063_s1 + $0x144] ss:$16 sps:$4 sm:$0xff]   ;;  %v705_v38 = vld [vmem:[%s1063_s1 + $0x108] ss:$16 sps:$4 sm:$0xff]  }
   0xe   :  { %v708_v39 = vld [vmem:[%s1063_s1 + $0x12c] ss:$16 sps:$4 sm:$0xff]   ;;  %v698_v40 = vld [vmem:[%s1063_s1 + $0x140] ss:$16 sps:$4 sm:$0xff]   ;;  %v700_v42 = vld [vmem:[%s1063_s1 + $0x164] ss:$16 sps:$4 sm:$0xff]  }
   0xf   :  { %442 = vmatpush1.bf16.msra.mxu0 %v656_v11  ;;  %483 = vmatpush1.bf16.msra.mxu1 %v675_v18  ;;  %v21_v41 = vld [vmem:[%s1062_s0] sm:$0xff]  ;;  %v711_v44 = vld [vmem:[%s1063_s1 + $0x128] ss:$16 sps:$4 sm:$0xff]   ;;  %v714_v45 = vld [vmem:[%s1063_s1 + $0x14c] ss:$16 sps:$4 sm:$0xff]  }
  0x10   :  { %443 = vmatprep.subr.bf16.mxu0 %v658_v12  ;;  %484 = vmatprep.subr.bf16.mxu1 %v678_v19  ;;  %v573_v43 = vcombine.high %v21_v41, %v21_v41  ;;  %v704_v46 = vld [vmem:[%s1063_s1 + $0x160] ss:$16 sps:$4 sm:$0xff]  }
  0x12   :  { %467 = vmatprep.mubr.bf16.mxu0 %v573_v43  ;;  %508 = vmatprep.mubr.bf16.mxu1 %v573_v43 }
  0x13   :  { %444 = vmatpush1.bf16.msra.mxu0 %v662_v16  ;;  %485 = vmatpush1.bf16.msra.mxu1 %v681_v22 }
  0x14   :  { %445 = vmatprep.subr.bf16.mxu0 %v664_v17  ;;  %486 = vmatprep.subr.bf16.mxu1 %v684_v23 }
  0x17   :  { %446 = vmatpush1.bf16.msra.mxu0 %v668_v20  ;;  %487 = vmatpush1.bf16.msra.mxu1 %v687_v26 }
  0x18   :  { %447 = vmatprep.subr.bf16.mxu0 %v670_v21  ;;  %488 = vmatprep.subr.bf16.mxu1 %v690_v27 }
  0x1b   :  { %448 = vmatpush1.bf16.msra.mxu0 %v674_v24  ;;  %489 = vmatpush1.bf16.msra.mxu1 %v693_v30 }
  0x1c   :  { %449 = vmatprep.subr.bf16.mxu0 %v676_v25  ;;  %490 = vmatprep.subr.bf16.mxu1 %v696_v31 }
  0x1f   :  { %450 = vmatpush1.bf16.msra.mxu0 %v680_v28  ;;  %491 = vmatpush1.bf16.msra.mxu1 %v699_v34 }
  0x20   :  { %451 = vmatprep.subr.bf16.mxu0 %v682_v29  ;;  %492 = vmatprep.subr.bf16.mxu1 %v702_v35 }
  0x23   :  { %452 = vmatpush1.bf16.msra.mxu0 %v686_v32  ;;  %493 = vmatpush1.bf16.msra.mxu1 %v705_v38 }
  0x24   :  { %453 = vmatprep.subr.bf16.mxu0 %v688_v33  ;;  %494 = vmatprep.subr.bf16.mxu1 %v708_v39 }
  0x27   :  { %454 = vmatpush1.bf16.msra.mxu0 %v692_v36 }
  0x28   :  { %455 = vmatprep.subr.bf16.mxu0 %v694_v37 }
  0x2b   :  { %456 = vmatpush1.bf16.msra.mxu0 %v698_v40 }
  0x2c   :  { %12 = vsyncpa [#allocation5], 0  ;;  %457 = vmatprep.subr.bf16.mxu0 %v700_v42  ;;  %v706_v47 = vld [vmem:[%s1063_s1 + $0x184] ss:$16 sps:$4 sm:$0xff]   ;;  %495 = vmatpush1.bf16.msra.mxu1 %v711_v44  ;;  %v717_v48 = vld [vmem:[%s1063_s1 + $0x148] ss:$16 sps:$4 sm:$0xff]   ;;  %v572_v1 = vcombine.low %v21_v41, %v21_v41  ;;  %v88_v3 = vlaneseq }
  0x2d   :  { %496 = vmatprep.subr.bf16.mxu1 %v714_v45  ;;  %v720_v49 = vld [vmem:[%s1063_s1 + $0x16c] ss:$16 sps:$4 sm:$0xff]   ;;  %v710_v50 = vld [vmem:[%s1063_s1 + $0x180] ss:$16 sps:$4 sm:$0xff]   ;;  %v712_v51 = vld [vmem:[%s1063_s1 + $0x1a4] ss:$16 sps:$4 sm:$0xff]  }
  0x2e   :  { %v723_v52 = vld [vmem:[%s1063_s1 + $0x168] ss:$16 sps:$4 sm:$0xff]   ;;  %v726_v53 = vld [vmem:[%s1063_s1 + $0x18c] ss:$16 sps:$4 sm:$0xff]   ;;  %v716_v54 = vld [vmem:[%s1063_s1 + $0x1a0] ss:$16 sps:$4 sm:$0xff]  }
  0x2f   :  { %458 = vmatpush1.bf16.msra.mxu0 %v704_v46  ;;  %v718_v55 = vld [vmem:[%s1063_s1 + $0x1c4] ss:$16 sps:$4 sm:$0xff]   ;;  %v729_v56 = vld [vmem:[%s1063_s1 + $0x188] ss:$16 sps:$4 sm:$0xff]   ;;  %v732_v57 = vld [vmem:[%s1063_s1 + $0x1ac] ss:$16 sps:$4 sm:$0xff]  }
  0x30   :  { %459 = vmatprep.subr.bf16.mxu0 %v706_v47  ;;  %497 = vmatpush1.bf16.msra.mxu1 %v717_v48  ;;  %v722_v58 = vld [vmem:[%s1063_s1 + $0x1c0] ss:$16 sps:$4 sm:$0xff]   ;;  %v724_v59 = vld [vmem:[%s1063_s1 + $0x1e4] ss:$16 sps:$4 sm:$0xff]   ;;  %v734_v60 = vld [vmem:[%s1063_s1 + $0x1a8] ss:$16 sps:$4 sm:$0xff]  }
  0x31   :  { %498 = vmatprep.subr.bf16.mxu1 %v720_v49  ;;  %v735_v61 = vld [vmem:[%s1063_s1 + $0x1cc] ss:$16 sps:$4 sm:$0xff]   ;;  %v728_v62 = vld [vmem:[%s1063_s1 + $0x1e0] ss:$16 sps:$4 sm:$0xff]   ;;  %v737_v63 = vld [vmem:[%s1063_s1 + $0x1c8] ss:$16 sps:$4 sm:$0xff]  }
  0x32   :  { %v738_v0 = vld [vmem:[%s1063_s1 + $0x1ec] ss:$16 sps:$4 sm:$0xff]   ;;  %v740_v2 = vld [vmem:[%s1063_s1 + $0x1e8] ss:$16 sps:$4 sm:$0xff]   ;;  %v89_v4 = vshrl.u32 %v88_v3, 7  ;;  %v537_v35 = vld [vmem:[%s1065_s3] sm:$0xff] }
  0x33   :  { %460 = vmatpush1.bf16.msra.mxu0 %v710_v50  ;;  %v86_v6 = vld [vmem:[%s1064_s2] sm:$0xf]  ;;  %s805_s23 = smov [#allocation4]  }
  0x34   :  { %461 = vmatprep.subr.bf16.mxu0 %v712_v51  ;;  %499 = vmatpush1.bf16.msra.mxu1 %v723_v52  ;;  %v90_v5 = vsub.s32 0, %v89_v4  ;;  %v94_v7 = vsub.s32 1, %v89_v4  ;;  %v98_v10 = vsub.s32 2, %v89_v4  ;;  %v102_v20 = vsub.s32 3, %v89_v4  ;;  %s560_s24 = sshll.u32 %s805_s23, 4  ;;  %s561_s24 = int_to_ptr.vmem [resolvable:$true] %s560_s24 }
  0x35   :  { %500 = vmatprep.subr.bf16.mxu1 %v726_v53  ;;  %s757_s25 = scalar_lea.vmem %s561_s24, 128  ;;  %p762_p1 = scmp.lt.s32.totalorder %s561_s24, %s561_s24 }
  0x36   :  { %v91_v8 = vrot.slane %v86_v6, %v90_v5  ;;  %v95_v9 = vrot.slane %v86_v6, %v94_v7  ;;  %v99_v18 = vrot.slane %v86_v6, %v98_v10  ;;  %v103_v25 = vrot.slane %v86_v6, %v102_v20  ;;  %p758_p0 = scmp.ne.s32.totalorder %s561_s24, %s757_s25  ;;  %p763_p2 = scmp.lt.s32.totalorder %s757_s25, %s757_s25 }
  0x37   :  { %462 = vmatpush1.bf16.msra.mxu0 %v716_v54 }
  0x38   :  { %463 = vmatprep.subr.bf16.mxu0 %v718_v55  ;;  %501 = vmatpush1.bf16.msra.mxu1 %v729_v56  ;;  %p764_p3 = por %p763_p2, %p762_p1 }
  0x39   :  { %502 = vmatprep.subr.bf16.mxu1 %v732_v57 }
  0x3a   :  { %p765_p4 = pnand %p764_p3, %p758_p0 }
  0x3b   :  { %464 = vmatpush1.bf16.msra.mxu0 %v722_v58 }
  0x3c   :  { %465 = vmatprep.subr.bf16.mxu0 %v724_v59  ;;  %503 = vmatpush1.bf16.msra.mxu1 %v734_v60 }
  0x3d   :  { %504 = vmatprep.subr.bf16.mxu1 %v735_v61 }
  0x3f   :  { %466 = vmatpush1.bf16.msra.mxu0 %v728_v62 }
  0x40   :  { %505 = vmatpush1.bf16.msra.mxu1 %v737_v63 }
  0x41   :  { %506 = vmatprep.subr.bf16.mxu1 %v738_v0 }
  0x42   :  { %468 = vmatmul.mubr.bf16.vlgmr.msra.gmra.mrb[0].mxu0 %v572_v1 }
  0x44   :  { %507 = vmatpush1.bf16.msra.mxu1 %v740_v2 }
  0x47   :  { %509 = vmatmul.mubr.bf16.vlgmr.msra.gmra.mrb[0].mxu1 %v572_v1 }
 0x115   :  { %v469_v11 = vpop.f32.mrb[0].mxu0 }
 0x116   :  { %v470_v12 = vadd.f32 %v469_v11, %v91_v8  ;;  %v471_v13 = vpop.f32.mrb[1].mxu0 }
 0x117   :  { %v472_v14 = vadd.f32 %v471_v13, %v95_v9  ;;  %v473_v15 = vpop.f32.mrb[2].mxu0 }
 0x118   :  { %v638_v16 = vmul.f32 -1.442695, %v470_v12  ;;  %v474_v17 = vpop.f32.mrb[3].mxu0 }
 0x119   :  { %v639_v19 = vmul.f32 -1.442695, %v472_v14 }
 0x11a   :  { %741 = vpow2.f32 %v638_v16  ;;  %v510_v21 = vpop.f32.mrb[0].mxu1 }
 0x11b   :  { %743 = vpow2.f32 %v639_v19  ;;  %v512_v22 = vpop.f32.mrb[1].mxu1  ;;  %v511_v23 = vadd.f32 %v510_v21, %v99_v18 }
 0x11c   :  { %v514_v24 = vpop.f32.mrb[2].mxu1  ;;  %v513_v28 = vadd.f32 %v512_v22, %v103_v25 }
 0x11d   :  { %v515_v26 = vpop.f32.mrb[3].mxu1  ;;  %v640_v27 = vmul.f32 -1.442695, %v511_v23 }
 0x11f   :  { %745 = vpow2.f32 %v640_v27 }
 0x120   :  { %747 = vtanh.f32 %v513_v28 }
 0x124   :  { %v742_v29 = vpop.eup %741 }
 0x125   :  { %v744_v30 = vpop.eup %743  ;;  %v526_v31 = vadd.f32 1.0, %v742_v29 }
 0x126   :  { %v527_v32 = vadd.f32 1.0, %v744_v30 }
 0x127   :  { %749 = vrcp.f32 %v526_v31 }
 0x128   :  { %751 = vrcp.f32 %v527_v32 }
 0x129   :  { %v746_v33 = vpop.eup %745 }
 0x12a   :  { %v748_v34 = vpop.eup %747  ;;  %v528_v37 = vadd.f32 1.0, %v746_v33 }
 0x12c   :  { %753 = vrcp.f32 %v528_v37 }
 0x131   :  { %v750_v36 = vpop.eup %749 }
 0x132   :  { %v752_v38 = vpop.eup %751  ;;  %v536_v39 = vmul.f32 %v750_v36, %v748_v34 }
 0x133   :  { %v538_v40 = vmul.f32 %v752_v38, %v537_v35 }
 0x135   :  { %v539_v41 = vadd.f32 %v538_v40, %v536_v39 }
 0x137   :  { %755 = vtanh.f32 %v539_v41  ;;  %543 = vst [vmem:[#allocation4] sm:$0xff] %v539_v41 }
 0x138   :  { %768 = shalt.err (!%p765_p4)
}
 0x139   :  { %s769_s27 = scalar_lea.hbm %s1067_s5, 128 }
 0x13a   :  { %p770_p5 = scmp.ne.s32.totalorder %s1067_s5, %s769_s27  ;;  %p773_p6 = scmp.lt.u32.totalorder %s769_s27, %s1067_s5 }
 0x13c   :  { %p775_p7 = pnand %p773_p6, %p770_p5 }
 0x13e   :  { %778 = shalt.err (!%p775_p7)
}
 0x13f   :  { %563 = dma.vmem_to_hbm [thread:$0]  %s561_s24, 128, %s1067_s5, [#allocation5]   ;;  %v754_v42 = vpop.eup %753 }
 0x140   :  { %s806_s8 = smov [#allocation2]  }
 0x141   :  { %s550_s9 = sshll.u32 %s806_s8, 4  ;;  %v756_v43 = vpop.eup %755  ;;  %s551_s9 = int_to_ptr.vmem [resolvable:$true] %s550_s9 }
 0x142   :  { %v541_v44 = vmul.f32 %v756_v43, %v754_v42  ;;  %s779_s10 = scalar_lea.vmem %s551_s9, 128  ;;  %p784_p9 = scmp.lt.s32.totalorder %s551_s9, %s551_s9 }
 0x143   :  { %p780_p8 = scmp.ne.s32.totalorder %s551_s9, %s779_s10  ;;  %p785_p10 = scmp.lt.s32.totalorder %s779_s10, %s779_s10 }
 0x144   :  { %542 = vst [vmem:[#allocation2] sm:$0xff] %v541_v44 }
 0x145   :  { %p786_p11 = por %p785_p10, %p784_p9 }
 0x147   :  { %p787_p12 = pnand %p786_p11, %p780_p8 }
 0x149   :  { %790 = shalt.err (!%p787_p12)
}
 0x14a   :  { %s791_s13 = scalar_lea.hbm %s1066_s4, 128 }
 0x14b   :  { %p792_p13 = scmp.ne.s32.totalorder %s1066_s4, %s791_s13  ;;  %p795_p0 = scmp.lt.u32.totalorder %s791_s13, %s1066_s4 }
 0x14d   :  { %p797_p1 = pnand %p795_p0, %p792_p13 }
 0x14f   :  { %800 = shalt.err (!%p797_p1)
}
 0x150   :  { %553 = dma.vmem_to_hbm [thread:$0]  %s551_s9, 128, %s1066_s4, [#allocation3]  }
 0x151   :  { %801 = dma.done.wait [#allocation3], 128  }
 0x152   :  { %802 = vsyncadd [#allocation3], 4294967168 }
 0x153   :  { %803 = dma.done.wait [#allocation5], 128  }
 0x154   :  { %804 = vsyncadd [#allocation5], 4294967168 }
 0x155   :  { %570 = vsyncpa [#allocation3], 1 }
 0x156   :  { %571 = vsyncpa [#allocation5], 1 }

</bundles_post_ra>
